<compile_context>
chip_gen: v7x
topology: tpu7x:2x2x1
jax: 0.10.0
libtpu: 0.0.40
codegen_flags: <defaults>
</compile_context>

<pallas_src>
import functools

import jax
import jax.numpy as jnp
from jax.experimental import pallas as pl
from jax.experimental.pallas import tpu as pltpu


def _maxpool1d_kernel(x_ref, o_ref, *, kernel_size, stride, l_out):
    """x_ref: (L_pad, C) VMEM block for one batch element; o_ref: (L_out, C)."""

    def window(k):
        # Rows k, k+stride, ..., k+(L_out-1)*stride  (sublane-strided load).
        if stride == 1:
            return x_ref[pl.ds(k, l_out), :]
        return x_ref[pl.ds(k, l_out, stride=stride), :]

    acc = window(0)
    for k in range(1, kernel_size):          # kernel_size is a small static int
        acc = jnp.maximum(acc, window(k))
    o_ref[...] = acc


def tmaxpool1d(vec, template=None, *, kernel_size, stride=None, padding=0):
    """Max pooling along dim 1 of a (B, L, C) array (channels-last layout).

    Equivalent to TMaxPool1d.forward: transpose -> nn.MaxPool1d -> transpose.
    `template` is accepted and ignored, matching the PyTorch module.
    """
    del template  # unused by the reference module's forward
    if stride is None:
        stride = kernel_size

    B, L, C = vec.shape
    dtype = vec.dtype
    l_out = (L + 2 * padding - kernel_size) // stride + 1
    assert l_out >= 1, "pooling parameters produce an empty output"

    x = vec
    if padding > 0:
        # Max-pool padding must be the identity of max (-inf / int min), NOT zero.
        if jnp.issubdtype(dtype, jnp.floating):
            pad_val = -jnp.inf
        else:
            pad_val = jnp.iinfo(dtype).min
        x = jnp.pad(x, ((0, 0), (padding, padding), (0, 0)),
                    constant_values=pad_val)
    l_pad = L + 2 * padding

    kernel = functools.partial(
        _maxpool1d_kernel, kernel_size=kernel_size, stride=stride, l_out=l_out
    )

    # TODO(synk): for very long sequences, tile L_out (with a halo of
    # kernel_size - stride rows) to keep each block <= ~4 MiB for v7x VMEM.
    out = pl.pallas_call(
        kernel,
        out_shape=jax.ShapeDtypeStruct((B, l_out, C), dtype),
        grid_spec=pltpu.PrefetchScalarGridSpec(
            num_scalar_prefetch=0,
            grid=(B,),
            in_specs=[pl.BlockSpec((None, l_pad, C), lambda b: (b, 0, 0))],
            out_specs=pl.BlockSpec((None, l_out, C), lambda b: (b, 0, 0)),
        ),
        compiler_params=pltpu.CompilerParams(
            dimension_semantics=("parallel",),
        ),
    )(x)
    return out


if __name__ == "__main__":
    key = jax.random.PRNGKey(0)
    B, L, C = 2, 16, 32
    kernel_size, stride, padding = 3, 2, 1

    kx, kt = jax.random.split(key)
    vec = jax.random.normal(kx, (B, L, C), dtype=jnp.float32)
    template = jax.random.normal(kt, (B, L, C), dtype=jnp.float32)  # ignored

    y = tmaxpool1d(vec, template,
                   kernel_size=kernel_size, stride=stride, padding=padding)
    y = jax.block_until_ready(y)

    # Pure-JAX reference: windowed max along dim 1 with -inf padding
    # (identical to transpose -> nn.MaxPool1d -> transpose).
    ref = jax.lax.reduce_window(
        vec, -jnp.inf, jax.lax.max,
        window_dimensions=(1, kernel_size, 1),
        window_strides=(1, stride, 1),
        padding=((0, 0), (padding, padding), (0, 0)),
    )

    l_out = (L + 2 * padding - kernel_size) // stride + 1
    assert y.shape == (B, l_out, C) and y.dtype == vec.dtype
    assert jnp.allclose(y, ref), "mismatch vs reference max-pool"

    print("KERNEL_OK")
</pallas_src>

<mosaic_0001>
module attributes {stable_mosaic.version = 11 : i64} {
  func.func @_maxpool1d_kernel(%arg0: i32, %arg1: memref<1x18x32xf32, #tpu.memory_space<vmem>>, %arg2: memref<1x8x32xf32, #tpu.memory_space<vmem>>) attributes {dimension_semantics = [#tpu.dimension_semantics<parallel>], iteration_bounds = array<i64: 2>, scalar_prefetch = 0 : i64, scratch_operands = 0 : i64, tpu.core_type = #tpu.core_type<tc>, window_params = [{transform_indices = @transform_0, window_bounds = array<i64: 1, 18, 32>}, {transform_indices = @transform_1, window_bounds = array<i64: 1, 8, 32>}]} {
    %c0 = arith.constant 0 : index
    %c0_0 = arith.constant 0 : index
    %c0_1 = arith.constant 0 : index
    %0 = tpu.strided_load %arg1[%c0, %c0_0, %c0_1] {strides = array<i32: 1, 2, 1>} : memref<1x18x32xf32, #tpu.memory_space<vmem>>, vector<1x8x32xf32>
    %1 = vector.shape_cast %0 : vector<1x8x32xf32> to vector<8x32xf32>
    %c0_2 = arith.constant 0 : index
    %c1 = arith.constant 1 : index
    %c0_3 = arith.constant 0 : index
    %2 = tpu.strided_load %arg1[%c0_2, %c1, %c0_3] {strides = array<i32: 1, 2, 1>} : memref<1x18x32xf32, #tpu.memory_space<vmem>>, vector<1x8x32xf32>
    %3 = vector.shape_cast %2 : vector<1x8x32xf32> to vector<8x32xf32>
    %4 = arith.maximumf %1, %3 : vector<8x32xf32>
    %c0_4 = arith.constant 0 : index
    %c2 = arith.constant 2 : index
    %c0_5 = arith.constant 0 : index
    %5 = tpu.strided_load %arg1[%c0_4, %c2, %c0_5] {strides = array<i32: 1, 2, 1>} : memref<1x18x32xf32, #tpu.memory_space<vmem>>, vector<1x8x32xf32>
    %6 = vector.shape_cast %5 : vector<1x8x32xf32> to vector<8x32xf32>
    %7 = arith.maximumf %4, %6 : vector<8x32xf32>
    %c0_6 = arith.constant 0 : index
    %c0_7 = arith.constant 0 : index
    %c0_8 = arith.constant 0 : index
    %8 = vector.load %arg2[%c0_6, %c0_7, %c0_8] : memref<1x8x32xf32, #tpu.memory_space<vmem>>, vector<1x8x32xf32>
    %9 = vector.shape_cast %8 : vector<1x8x32xf32> to vector<8x32xf32>
    %10 = vector.shape_cast %7 : vector<8x32xf32> to vector<1x8x32xf32>
    tpu.vector_store %arg2[%c0_6, %c0_7, %c0_8], %10 {strides = array<i32>} : memref<1x8x32xf32, #tpu.memory_space<vmem>>, vector<1x8x32xf32>,
    return
  }
  func.func @transform_0(%arg0: i32) -> (i32, i32, i32) {
    %c0_i32 = arith.constant 0 : i32
    %c0_i32_0 = arith.constant 0 : i32
    %c0_i32_1 = arith.constant 0 : i32
    return %arg0, %c0_i32, %c0_i32_0 : i32, i32, i32
  }
  func.func @transform_1(%arg0: i32) -> (i32, i32, i32) {
    %c0_i32 = arith.constant 0 : i32
    %c0_i32_0 = arith.constant 0 : i32
    %c0_i32_1 = arith.constant 0 : i32
    return %arg0, %c0_i32, %c0_i32_0 : i32, i32, i32
  }
}

</mosaic_0001>

<bundles_post_ra>
// kernel: tpu_custom_call.1
= control target key start
LH: loop header
LB: loop body
LE: loop exit
PB: predicated region body
PF: predicated region fallthrough
CT: control target
= control target key end

     0   :  { %6 = vsyncpa [#allocation3], 0  ;;  %s424_s0 = inlined_call_operand.vmem [shape: f32[2,18,32], index: 0, kind: input, shape index: {}]   ;;  %s425_s1 = inlined_call_operand.hbm [shape: f32[2,8,32], index: 1, kind: output, shape index: {}]  }
   0x1   :  { %8 = vsyncpa [#allocation3 + $0x1], 0  ;;  %s324_s6 = smov 0   ;;  %s326_s7 = smov 0  }
   0x2   :  { %s328_s8 = smov 0   ;;  %s330_s9 = smov 0  }
   0x3 LB: > { %s345_s10 = sadd.s32 4294967295, %s311_s9   ;;  %s197_s11 = sadd.s32 4294967294, %s311_s9   ;;  %s311_s9 = sphi %s330_s9, %s431_s9   ;;  %s307_s8 = sphi %s328_s8, %s430_s8   ;;  %s303_s7 = sphi %s326_s7, %s429_s7   ;;  %s299_s6 = sphi %s324_s6, %s428_s6  }
   0x4   : > { %s349_s12 = sadd.s32 1, %s311_s9   ;;  %s47_s13 = sadd.s32 1, %s307_s8 }
   0x5   : > { %s44_s14 = ssub.s32 %s311_s9, %s349_s12  ;;  %p57_p0 = scmp.ne.s32.totalorder %s307_s8, %s303_s7 }
   0x6   : > { %p45_p1 = scmp.eq.s32.totalorder %s44_s14, 0  ;;  %p58_p2 = scmp.eq.s32.totalorder %s345_s10, 1 }
   0x7   : > { %p63_p3 = scmp.ne.s32.totalorder %s303_s7, %s299_s6  ;;  %p64_p4 = scmp.eq.s32.totalorder %s197_s11, 1 }
   0x8   : > { %s360_s15 = scalar_select %p45_p1, %s307_s8, %s47_s13  }
   0x9   : > { %p362_p5 = por %p58_p2, %p57_p0  ;;  %p366_p6 = por %p64_p4, %p63_p3 }
   0xa   : > { %p200_p7 = scmp.ge.s32.totalorder %s311_s9, 1  ;;  %p90_p8 = scmp.lt.s32.totalorder %s311_s9, 3 }
   0xc   : > { %p91_p9 = pnand %p200_p7, %p90_p8 }
   0xd   : > { %s107_s18 = sand.u32 (!%p91_p9), 1, %s303_s7   ;;  %p110_p10 = scmp.lt.s32.totalorder (!%p91_p9), %s345_s10, 1  ;;  %vm122_vm0 = vcmask (!%p91_p9), 261120  }
   0xe   : > { %94 = sbr.rel (%p91_p9) target bundleno = 45 (0x2d), region = 24  ;;  %s201_s19 = sshll.u32 (!%p91_p9), %s107_s18, 3 }
   0xf   : > { %s206_s22 = sshll.u32 (!%p91_p9), %s345_s10, 7  ;;  %s109_s26 = scalar_lea.vmem (!%p91_p9), [#allocation2], %s201_s19 }
  0x10   : > { %s138_s27 = sshll.u32 (!%p91_p9), %s109_s26, 4  ;;  %s384_s30 = scalar_lea.hbm (!%p91_p9), %s425_s1, %s206_s22  ;;  %s379_s27 = int_to_ptr.vmem [resolvable:$true] %s138_s27 }
  0x11   : > { %s125_s2 = scalar_lea.sflag (!%p91_p9), [#allocation3], %s107_s18  ;;  %s249_s3 = scalar_lea.vmem (!%p91_p9), %s379_s27, 128 }
  0x12   : > { %p250_p11 = scmp.ne.s32.totalorder (!%p91_p9), %s379_s27, %s249_s3  ;;  %s313_s4 = smov (!%p91_p9), [#allocation2]  }
  0x13   : > { %s253_s5 = sshll.u32 (!%p91_p9), %s313_s4, 4  ;;  %s254_s5 = int_to_ptr.vmem [resolvable:$false] %s253_s5 }
  0x14   : > { %p251_p12 = pnand (!%p91_p9), %p250_p11, %p362_p5  ;;  %p256_p0 = scmp.lt.s32.totalorder (!%p91_p9), %s379_s27, %s254_s5 }
  0x15   : > { %s111_s20 = scalar_select %p110_p10, %s345_s10, 1 }
  0x16   : > { %p252_p13 = pneg %p251_p12  ;;  %s255_s10 = scalar_lea.vmem %s254_s5, 256 }
  0x17   : > { %s209_s21 = smul.u32 24, %s111_s20  ;;  %p257_p1 = scmp.lt.s32.totalorder %s255_s10, %s249_s3 }
  0x19   : > { %s114_s25 = scalar_lea.vmem %s424_s0, %s209_s21  ;;  %p258_p2 = por %p257_p1, %p256_p0 }
  0x1a   : > { %v115_v0 = vld [vmem:[%s114_s25] ss:$2 sm:$0xff]  ;;  %v203_v1 = vld [vmem:[%s114_s25 + $0x1] ss:$2 sm:$0xff] }
  0x1b   : > { %v204_v2 = vld [vmem:[%s114_s25 + $0x2] ss:$2 sm:$0xff]  ;;  %v118_v3 = vmax.f32 %v115_v0, %v203_v1  ;;  %p259_p3 = pnand %p258_p2, %p252_p13 }
  0x1d   : > { %v121_v4 = vmax.f32 %v118_v3, %v204_v2 }
  0x1f   : > { %123 = vst.msk [vmem:[%s109_s26] sm:$0xff] %vm122_vm0, %v121_v4 }
  0x20   : > { %262 = shalt.err (!%p259_p3)
}
  0x21   : > { %s263_s11 = scalar_lea.hbm %s384_s30, 128  ;;  %s267_s18 = scalar_lea.hbm %s425_s1, 256 }
  0x22   : > { %p264_p4 = scmp.ne.s32.totalorder %s384_s30, %s263_s11  ;;  %p268_p9 = scmp.lt.u32.totalorder %s384_s30, %s425_s1 }
  0x23   : > { %p269_p10 = scmp.lt.u32.totalorder %s267_s18, %s263_s11  ;;  %p271_p12 = scmp.lt.u32.totalorder %s263_s11, %s384_s30 }
  0x24   : > { %p265_p7 = pnand %p264_p4, %p362_p5 }
  0x25   : > { %p270_p11 = por %p269_p10, %p268_p9 }
  0x26   : > { %p266_p8 = pneg %p265_p7 }
  0x27   : > { %p272_p13 = por %p271_p12, %p270_p11 }
  0x29   : > { %p273_p0 = pnand %p272_p13, %p266_p8 }
  0x2b   : > { %276 = shalt.err (!%p273_p0)
}
  0x2c   : > { %210 = dma.vmem_to_hbm [thread:$0]  (%p362_p5), %s379_s27, 128, %s384_s30, %s125_s2  }
  0x2d PF: > { %p216_p1 = scmp.ge.s32.totalorder %s311_s9, 2  ;;  %s150_s21 = sand.u32 1, %s299_s6  }
  0x2e   : > { %s151_s22 = scalar_lea.sflag [#allocation3], %s150_s21 }
  0x2f   : > { %p213_p2 = pnand %p216_p1, %p366_p6 }
  0x31   : > { %294 = dma.done.wait (!%p213_p2), %s151_s22, 128  }
  0x32   : > { %296 = vsyncadd (!%p213_p2), %s151_s22, 4294967168  ;;  %p11_p3 = scmp.ge.s32.totalorder %s349_s12, 4   ;;  %s428_s6 = smov %s303_s7 }
  0x33   : > { %s429_s7 = smov %s307_s8  ;;  %s430_s8 = smov %s360_s15 }
  0x34   : > { %s431_s9 = smov %s349_s12  ;;  %13 = sbr.rel (!%p11_p3) target bundleno = 3 (0x3), region = 61 }
  0x3b   :  { %156 = vsyncpa [#allocation3], 1 }
  0x3c   :  { %158 = vsyncpa [#allocation3 + $0x1], 1 }

</bundles_post_ra>
